<compile_context>
chip_gen: v7x
topology: tpu7x:2x2x1
jax: 0.10.0
libtpu: 0.0.40
codegen_flags: <defaults>
</compile_context>

<pallas_src>
import jax
import jax.numpy as jnp
from jax.experimental import pallas as pl
from jax.experimental.pallas import tpu as pltpu


# Double-buffered working set target (x-in + out + mask tiles, x2 buffers).
_WORKING_SET_BYTES = 24 * 1024 * 1024
# Explicit scoped-VMEM limit: above the 16/32 MiB generation defaults and
# comfortably below v7x's 64 MiB physical VMEM.
_VMEM_LIMIT_BYTES = 48 * 1024 * 1024
# Cap on the lane-axis tile (multiple of 128).
_MAX_LANE_TILE = 8192


def _vhd_mul_kernel(x_ref, m_ref, o_ref):
    # m_ref is (rt, 1) for spatial dropout (broadcast over lanes) or
    # (rt, ht) for the dense (non-spatial) mask.  Multiply in f32 so the
    # 1/(1-p) scale is applied at full precision, then cast on store.
    x = x_ref[...].astype(jnp.float32)
    o_ref[...] = (x * m_ref[...]).astype(o_ref.dtype)


def _choose_tiles(rows, hw, x_itemsize, spatial):
    """Pick (rt, ht) keeping the double-buffered working set in budget."""
    # Sub-32-bit dtypes pack 2/4 rows per sublane -> bigger row granularity.
    gran = {4: 8, 2: 16, 1: 32}.get(x_itemsize, 8)

    # Lane tile: lane-dense multiple of 128 when possible, else the full
    # array extent (always a legal block last-dim).
    if hw % 128 == 0:
        ht = min(hw, _MAX_LANE_TILE)
    else:
        ht = hw

    mask_cols = 1 if spatial else ht
    # 2x for double buffering; x tile + out tile + f32 mask tile per row.
    per_row_bytes = 2 * (2 * ht * x_itemsize + mask_cols * 4)
    max_rt = max(gran, _WORKING_SET_BYTES // max(per_row_bytes, 1))

    rt = min(rows, max_rt)
    if rt >= gran:
        rt = (rt // gran) * gran      # multiple of the sublane pack
    else:
        rt = rows                     # tiny tensor: take the full extent
    return rt, ht


@jax.jit
def _vhd_apply(x, m):
    """x: (N,C,H,W); m: f32 of shape (N,C,1,1) (spatial) or (N,C,H,W)."""
    n, c, h, w = x.shape
    rows, hw = n * c, h * w
    spatial = (m.shape != x.shape)

    x2 = x.reshape(rows, hw)
    m2 = m.reshape(rows, 1) if spatial else m.reshape(rows, hw)

    itemsize = jnp.dtype(x.dtype).itemsize
    rt, ht = _choose_tiles(rows, hw, itemsize, spatial)
    grid = (pl.cdiv(rows, rt), pl.cdiv(hw, ht))

    if spatial:
        m_spec = pl.BlockSpec((rt, 1), lambda i, j: (i, 0))
    else:
        m_spec = pl.BlockSpec((rt, ht), lambda i, j: (i, j))

    x_bytes = rows * hw * itemsize
    m_bytes = m2.size * 4
    cost = pl.CostEstimate(flops=rows * hw, transcendentals=0,
                           bytes_accessed=2 * x_bytes + m_bytes)

    y2 = pl.pallas_call(
        _vhd_mul_kernel,
        out_shape=jax.ShapeDtypeStruct((rows, hw), x.dtype),
        grid=grid,
        in_specs=[
            pl.BlockSpec((rt, ht), lambda i, j: (i, j)),
            m_spec,
        ],
        out_specs=pl.BlockSpec((rt, ht), lambda i, j: (i, j)),
        compiler_params=pltpu.CompilerParams(
            dimension_semantics=("parallel", "parallel"),
            vmem_limit_bytes=_VMEM_LIMIT_BYTES),
        cost_estimate=cost,
    )(x2, m2)
    return y2.reshape(n, c, h, w)


class VariationalHidDropout2dList:
    """JAX/Pallas port of the PyTorch module (forward hot-path in Pallas)."""

    def __init__(self, dropout=0.0, spatial=True):
        self.dropout = dropout
        self.spatial = spatial
        self.mask = None
        self.training = True

    def reset_mask(self, xs, key):
        dropout = self.dropout
        self.mask = []
        keys = jax.random.split(key, len(xs))
        for k, x in zip(keys, xs):
            n, c, h, w = x.shape
            shape = (n, c, 1, 1) if self.spatial else (n, c, h, w)
            m = jax.random.bernoulli(k, p=1.0 - dropout, shape=shape)
            # Keep the mask in f32 so the 1/(1-p) scale is not rounded for
            # low-precision x dtypes; the kernel casts the product on store.
            m = m.astype(jnp.float32) / (1.0 - dropout)
            self.mask.append(m)
        return self.mask

    def __call__(self, xs):
        if not self.training or self.dropout == 0:
            return xs
        assert self.mask is not None and len(self.mask) > 0, (
            "You need to reset mask before using VariationalHidDropoutList")
        # TODO(synk): fuse the whole list into a single pallas_call (per-dtype
        # concatenated slabs / PrefetchScalarGridSpec row offsets) to amortize
        # launch overhead for long lists of small tensors.
        # TODO(synk): for spatial=False, regenerate the Bernoulli mask
        # in-kernel from a stored seed (pltpu.prng_*) to avoid streaming the
        # dense mask from HBM.
        return [_vhd_apply(x, m) for m, x in zip(self.mask, xs)]


if __name__ == "__main__":
    key = jax.random.PRNGKey(0)
    k_x0, k_x1, k_x2, k_mask, k_mask_ns = jax.random.split(key, 5)

    # Small NCHW inputs (list, as the module expects a list of tensors).
    xs = [
        jax.random.normal(k_x0, (2, 4, 16, 16), dtype=jnp.float32),
        jax.random.normal(k_x1, (2, 8, 8, 8), dtype=jnp.float32),
        jax.random.normal(k_x2, (2, 4, 16, 16), dtype=jnp.float32
                          ).astype(jnp.bfloat16),
    ]

    ok = True

    # --- Spatial (default) path -------------------------------------------
    mod = VariationalHidDropout2dList(dropout=0.25, spatial=True)
    mod.training = True
    mod.reset_mask(xs, k_mask)
    outs = mod(xs)
    outs = [jax.block_until_ready(o) for o in outs]

    for x, m, o in zip(xs, mod.mask, outs):
        ref = (x.astype(jnp.float32) * m).astype(x.dtype)  # broadcast mask
        tol = 1e-6 if x.dtype == jnp.float32 else 1e-2
        ok = ok and bool(jnp.allclose(o.astype(jnp.float32),
                                      ref.astype(jnp.float32),
                                      atol=tol, rtol=tol))
        ok = ok and (o.shape == x.shape) and (o.dtype == x.dtype)

    # --- Non-spatial (dense mask) path -------------------------------------
    mod_ns = VariationalHidDropout2dList(dropout=0.5, spatial=False)
    mod_ns.training = True
    xs_ns = [xs[1]]
    mod_ns.reset_mask(xs_ns, k_mask_ns)
    outs_ns = [jax.block_until_ready(o) for o in mod_ns(xs_ns)]
    ref_ns = (xs_ns[0].astype(jnp.float32) * mod_ns.mask[0]).astype(
        xs_ns[0].dtype)
    ok = ok and bool(jnp.allclose(outs_ns[0], ref_ns, atol=1e-6, rtol=1e-6))

    # --- Eval / dropout==0 passthrough --------------------------------------
    mod_eval = VariationalHidDropout2dList(dropout=0.25, spatial=True)
    mod_eval.training = False
    same = mod_eval(xs)
    ok = ok and all(a is b for a, b in zip(same, xs))

    if ok:
        print("KERNEL_OK")
    else:
        print("KERNEL_MISMATCH")
</pallas_src>

<mosaic_0001>
module attributes {stable_mosaic.version = 11 : i64} {
  func.func @_vhd_mul_kernel(%arg0: i32, %arg1: i32, %arg2: memref<8x256xf32, #tpu.memory_space<vmem>>, %arg3: memref<8x1xf32, #tpu.memory_space<vmem>>, %arg4: memref<8x256xf32, #tpu.memory_space<vmem>>) attributes {dimension_semantics = [#tpu.dimension_semantics<parallel>, #tpu.dimension_semantics<parallel>], iteration_bounds = array<i64: 1, 1>, scalar_prefetch = 0 : i64, scratch_operands = 0 : i64, tpu.core_type = #tpu.core_type<tc>, window_params = [{transform_indices = @transform_0, window_bounds = array<i64: 8, 256>}, {transform_indices = @transform_1, window_bounds = array<i64: 8, 1>}, {transform_indices = @transform_2, window_bounds = array<i64: 8, 256>}]} {
    %c0 = arith.constant 0 : index
    %c0_0 = arith.constant 0 : index
    %0 = vector.load %arg2[%c0, %c0_0] : memref<8x256xf32, #tpu.memory_space<vmem>>, vector<8x256xf32>
    %c0_1 = arith.constant 0 : index
    %c0_2 = arith.constant 0 : index
    %1 = vector.load %arg3[%c0_1, %c0_2] : memref<8x1xf32, #tpu.memory_space<vmem>>, vector<8x1xf32>
    %2 = vector.broadcast %1 : vector<8x1xf32> to vector<8x256xf32>
    %3 = arith.mulf %0, %2 : vector<8x256xf32>
    %c0_3 = arith.constant 0 : index
    %c0_4 = arith.constant 0 : index
    %4 = vector.load %arg4[%c0_3, %c0_4] : memref<8x256xf32, #tpu.memory_space<vmem>>, vector<8x256xf32>
    tpu.vector_store %arg4[%c0_3, %c0_4], %3 {strides = array<i32>} : memref<8x256xf32, #tpu.memory_space<vmem>>, vector<8x256xf32>,
    return
  }
  func.func @transform_0(%arg0: i32, %arg1: i32) -> (i32, i32) {
    %c0_i32 = arith.constant 0 : i32
    return %arg0, %arg1 : i32, i32
  }
  func.func @transform_1(%arg0: i32, %arg1: i32) -> (i32, i32) {
    %c0_i32 = arith.constant 0 : i32
    %c0_i32_0 = arith.constant 0 : i32
    return %arg0, %c0_i32 : i32, i32
  }
  func.func @transform_2(%arg0: i32, %arg1: i32) -> (i32, i32) {
    %c0_i32 = arith.constant 0 : i32
    return %arg0, %arg1 : i32, i32
  }
}

</mosaic_0001>

<bundles_post_ra>
// kernel: _vhd_apply.1
= control target key start
LH: loop header
LB: loop body
LE: loop exit
PB: predicated region body
PF: predicated region fallthrough
CT: control target
= control target key end

     0   :  { %v29_v0 = vmov 0   ;;  %s60_s1 = inlined_call_operand.vmem [shape: f32[8,1], index: 1, kind: input, shape index: {}]   ;;  %s61_s0 = inlined_call_operand.vmem [shape: f32[8,256], index: 0, kind: input, shape index: {}]   ;;  %s62_s2 = inlined_call_operand.vmem [shape: f32[8,256], index: 2, kind: output, shape index: {}]  }
   0x1   :  { %28 = vset.pattern.permute.xlu0 %v29_v0  ;;  %v13_v1 = vld [vmem:[%s60_s1] sm:$0xff]  ;;  %v12_v3 = vld [vmem:[%s61_s0 + $0x8] sm:$0xff] }
   0x2   :  { %16 = vperm.xlu0 %28, %v13_v1   ;;  %v11_v2 = vld [vmem:[%s61_s0] sm:$0xff] }
  0x81   :  { %v17_v4 = vpop.permute.xlu0 %16 }
  0x82   :  { %v19_v5 = vmul.f32 %v17_v4, %v11_v2  ;;  %v20_v6 = vmul.f32 %v17_v4, %v12_v3 }
  0x84   :  { %21 = vst [vmem:[%s62_s2] sm:$0xff] %v19_v5  ;;  %22 = vst [vmem:[%s62_s2 + $0x8] sm:$0xff] %v20_v6 }

</bundles_post_ra>
